<compile_context>
chip_gen: v5e
topology: v5e:2x2
jax: 0.10.0
libtpu: 0.0.40
codegen_flags: <defaults>
</compile_context>

<pallas_src>
import jax
import jax.numpy as jnp
from jax.experimental import pallas as pl
from jax.experimental.pallas import tpu as pltpu


# --------------------------------------------------------------------------
# Stage 1: diff = relu(embed_cat) @ W_cat + b_diff          (run once, tiny)
# --------------------------------------------------------------------------
def diff_kernel(emb_ref, wcat_ref, bdiff_ref, diff_ref):
    # relu(concat) == concat(relu): the concat was done on the host, relu here.
    h = jnp.maximum(emb_ref[...], 0.0)                                   # (N, 2H)
    d = jnp.dot(h, wcat_ref[...],
                preferred_element_type=jnp.float32) + bdiff_ref[...]     # (N, A)
    diff_ref[...] = d.astype(diff_ref.dtype)                             # f32 -> (bf16|f32)


# --------------------------------------------------------------------------
# Stage 2: out[:, tile] = diff @ xT[:, tile]                 (streamed over M)
# --------------------------------------------------------------------------
def score_kernel(diff_ref, xT_ref, out_ref):
    out = jnp.dot(diff_ref[...], xT_ref[...],
                  preferred_element_type=jnp.float32)                    # (N, bm) f32 acc
    out_ref[...] = out.astype(out_ref.dtype)


def prepare_params(params):
    """One-time parameter prep (hoisted out of the per-call forward path)."""
    w_cat = jnp.concatenate([params["w_acc"].T, -params["w_rej"].T], axis=0)  # (2H, A)
    b_diff = (params["b_acc"] - params["b_rej"])[None, :]                     # (1, A)
    return {"w_cat": w_cat, "b_diff": b_diff}


def neg_ranker_forward(x, acc_embed, rej_embed, prepared, *,
                       block_m=512, use_bf16=True, out_dtype=jnp.float32):
    """x: (1, M, A) or (M, A); acc_embed/rej_embed: (1, N, H) or (N, H)."""
    assert block_m % 128 == 0, "block_m must be a multiple of 128 (lane-dense vst)"

    # squeeze(0) glue stays in plain JAX
    if x.ndim == 3:
        x = x[0]
    if acc_embed.ndim == 3:
        acc_embed = acc_embed[0]
    if rej_embed.ndim == 3:
        rej_embed = rej_embed[0]

    embed_cat = jnp.concatenate([acc_embed, rej_embed], axis=-1)   # (N, 2H) f32
    w_cat = prepared["w_cat"]                                      # (2H, A) f32
    b_diff = prepared["b_diff"]                                    # (1, A)  f32

    N, H2 = embed_cat.shape
    M, A = x.shape

    stream_dtype = jnp.bfloat16 if use_bf16 else jnp.float32
    stream_isize = jnp.dtype(stream_dtype).itemsize
    out_isize = jnp.dtype(out_dtype).itemsize

    # ---------------- Stage 1 (single step, whole problem in VMEM) ----------------
    # TODO(synk): if use_bf16 and N is huge, pad N to a multiple of 16 for optimal
    # bf16 sublane packing of `diff`; correctness does not require it.
    cost1 = pl.CostEstimate(
        flops=2 * N * H2 * A,
        transcendentals=0,
        bytes_accessed=4 * (N * H2 + H2 * A + A) + N * A * stream_isize,
    )
    diff = pl.pallas_call(
        diff_kernel,
        out_shape=jax.ShapeDtypeStruct((N, A), stream_dtype),
        grid=(1,),
        in_specs=[
            pl.BlockSpec((N, H2), lambda i: (0, 0)),
            pl.BlockSpec((H2, A), lambda i: (0, 0)),
            pl.BlockSpec((1, A), lambda i: (0, 0)),
        ],
        out_specs=pl.BlockSpec((N, A), lambda i: (0, 0)),
        compiler_params=pltpu.CompilerParams(
            dimension_semantics=("arbitrary",)),
        cost_estimate=cost1,
    )(embed_cat, w_cat, b_diff)

    # ---------------- Stage 2 (streamed over M, "parallel") ----------------
    # Lane-dense layout: x -> (A, M), padded so M is a multiple of bm (bm % 128 == 0).
    m128 = pl.cdiv(M, 128) * 128
    bm = min(block_m, m128)
    M_pad = pl.cdiv(M, bm) * bm
    grid_m = M_pad // bm

    xT = jnp.transpose(x).astype(stream_dtype)                     # (A, M)
    if M_pad != M:
        xT = jnp.pad(xT, ((0, 0), (0, M_pad - M)))                 # zero cols -> masked away below

    # Explicit VMEM budget: double-buffered x tile + out tile + resident diff,
    # with headroom; >=32 MiB so v5e's 16 MiB default never binds, <=64 MiB for v7x.
    ws = (2 * A * bm * stream_isize
          + 2 * N * bm * out_isize
          + 2 * N * A * stream_isize)
    vmem_limit = int(min(64 * 2**20, max(32 * 2**20, 2 * ws + (4 << 20))))

    cost2 = pl.CostEstimate(
        flops=2 * N * A * M_pad,
        transcendentals=0,
        bytes_accessed=N * A * stream_isize + A * M_pad * stream_isize + N * M_pad * out_isize,
    )

    out_pad = pl.pallas_call(
        score_kernel,
        out_shape=jax.ShapeDtypeStruct((N, M_pad), out_dtype),
        grid=(grid_m,),
        in_specs=[
            pl.BlockSpec((N, A), lambda j: (0, 0)),    # diff: resident, no recompute
            pl.BlockSpec((A, bm), lambda j: (0, j)),   # xT tile: lane-dense over M
        ],
        out_specs=pl.BlockSpec((N, bm), lambda j: (0, j)),
        compiler_params=pltpu.CompilerParams(
            dimension_semantics=("parallel",),
            vmem_limit_bytes=vmem_limit),
        cost_estimate=cost2,
        # TODO(synk): bump pipeline_mode=pl.Buffered(3) on xT/out only if profiling
        # shows exposed output-writeback DMA (mainly v5e) and VMEM allows it.
    )(diff, xT)

    if M_pad != M:
        return out_pad[:, :M]
    return out_pad


def init_params(key, hidden_size, action_size):
    k1, k2, k3, k4 = jax.random.split(key, 4)
    bound = 1.0 / jnp.sqrt(hidden_size)
    return {
        "w_acc": jax.random.uniform(k1, (action_size, hidden_size),
                                    jnp.float32, -bound, bound),
        "b_acc": jax.random.uniform(k2, (action_size,), jnp.float32, -bound, bound),
        "w_rej": jax.random.uniform(k3, (action_size, hidden_size),
                                    jnp.float32, -bound, bound),
        "b_rej": jax.random.uniform(k4, (action_size,), jnp.float32, -bound, bound),
    }


if __name__ == "__main__":
    hidden_size = 32    # H
    action_size = 32    # A
    N = 8               # rows in acc/rej embeddings
    M = 16              # number of items in x

    key = jax.random.PRNGKey(0)
    kp, kx, ka, kr = jax.random.split(key, 4)

    params = init_params(kp, hidden_size, action_size)
    prepared = prepare_params(params)            # one-time, outside forward path

    x = jax.random.normal(kx, (1, M, action_size), jnp.float32)
    acc_embed = jax.random.normal(ka, (1, N, hidden_size), jnp.float32)
    rej_embed = jax.random.normal(kr, (1, N, hidden_size), jnp.float32)

    # f32 streamed stage (tight check) and bf16 streamed stage (default, looser check)
    out_f32 = neg_ranker_forward(x, acc_embed, rej_embed, prepared, use_bf16=False)
    out_bf16 = neg_ranker_forward(x, acc_embed, rej_embed, prepared, use_bf16=True)
    out_f32, out_bf16 = jax.block_until_ready((out_f32, out_bf16))

    # plain-JAX reference (original, un-fused PyTorch formulation, f32)
    acc_ref = jnp.maximum(acc_embed[0], 0.0) @ params["w_acc"].T + params["b_acc"]
    rej_ref = jnp.maximum(rej_embed[0], 0.0) @ params["w_rej"].T + params["b_rej"]
    ref = acc_ref @ x[0].T - rej_ref @ x[0].T

    assert out_f32.shape == (N, M)
    assert out_bf16.shape == (N, M)
    assert jnp.allclose(out_f32, ref, atol=2e-3, rtol=2e-3)
    # bf16 second-stage operands -> ~0.4% relative rounding per operand; loose check.
    assert jnp.allclose(out_bf16, ref, atol=1e-1, rtol=1e-1)

    print("KERNEL_OK")
</pallas_src>

<mosaic_0001>
module attributes {stable_mosaic.version = 11 : i64} {
  func.func @diff_kernel(%arg0: i32, %arg1: memref<8x64xf32, #tpu.memory_space<vmem>>, %arg2: memref<64x32xf32, #tpu.memory_space<vmem>>, %arg3: memref<1x32xf32, #tpu.memory_space<vmem>>, %arg4: memref<8x32xf32, #tpu.memory_space<vmem>>) attributes {dimension_semantics = [#tpu.dimension_semantics<arbitrary>], iteration_bounds = array<i64: 1>, scalar_prefetch = 0 : i64, scratch_operands = 0 : i64, tpu.core_type = #tpu.core_type<tc>, window_params = [{pipeline_mode = #tpu.pipeline_mode<synchronous>, transform_indices = @transform_0, window_bounds = array<i64: 8, 64>}, {pipeline_mode = #tpu.pipeline_mode<synchronous>, transform_indices = @transform_1, window_bounds = array<i64: 64, 32>}, {pipeline_mode = #tpu.pipeline_mode<synchronous>, transform_indices = @transform_2, window_bounds = array<i64: 1, 32>}, {pipeline_mode = #tpu.pipeline_mode<synchronous>, transform_indices = @transform_3, window_bounds = array<i64: 8, 32>}]} {
    %c0 = arith.constant 0 : index
    %c0_0 = arith.constant 0 : index
    %0 = vector.load %arg1[%c0, %c0_0] : memref<8x64xf32, #tpu.memory_space<vmem>>, vector<8x64xf32>
    %cst = arith.constant 0.000000e+00 : f32
    %1 = vector.broadcast %cst : f32 to vector<8x64xf32>
    %2 = arith.maximumf %0, %1 : vector<8x64xf32>
    %c0_1 = arith.constant 0 : index
    %c0_2 = arith.constant 0 : index
    %3 = vector.load %arg2[%c0_1, %c0_2] : memref<64x32xf32, #tpu.memory_space<vmem>>, vector<64x32xf32>
    %cst_3 = arith.constant dense<0.000000e+00> : vector<8x32xf32>
    %4 = tpu.matmul %2, %3, %cst_3 {dimension_numbers = #tpu.dot_dimension_numbers<[1], [0], [0], [1], [0, 0, 1, 1], [], []>} : vector<8x64xf32>, vector<64x32xf32>, vector<8x32xf32> -> vector<8x32xf32>
    %c0_4 = arith.constant 0 : index
    %c0_5 = arith.constant 0 : index
    %5 = vector.load %arg3[%c0_4, %c0_5] : memref<1x32xf32, #tpu.memory_space<vmem>>, vector<1x32xf32>
    %6 = vector.broadcast %5 : vector<1x32xf32> to vector<8x32xf32>
    %7 = arith.addf %4, %6 : vector<8x32xf32>
    %c0_6 = arith.constant 0 : index
    %c0_7 = arith.constant 0 : index
    %8 = vector.load %arg4[%c0_6, %c0_7] : memref<8x32xf32, #tpu.memory_space<vmem>>, vector<8x32xf32>
    tpu.vector_store %arg4[%c0_6, %c0_7], %7 {strides = array<i32>} : memref<8x32xf32, #tpu.memory_space<vmem>>, vector<8x32xf32>,
    return
  }
  func.func @transform_0(%arg0: i32) -> (i32, i32) {
    %c0_i32 = arith.constant 0 : i32
    %c0_i32_0 = arith.constant 0 : i32
    %c0_i32_1 = arith.constant 0 : i32
    return %c0_i32, %c0_i32_0 : i32, i32
  }
  func.func @transform_1(%arg0: i32) -> (i32, i32) {
    %c0_i32 = arith.constant 0 : i32
    %c0_i32_0 = arith.constant 0 : i32
    %c0_i32_1 = arith.constant 0 : i32
    return %c0_i32, %c0_i32_0 : i32, i32
  }
  func.func @transform_2(%arg0: i32) -> (i32, i32) {
    %c0_i32 = arith.constant 0 : i32
    %c0_i32_0 = arith.constant 0 : i32
    %c0_i32_1 = arith.constant 0 : i32
    return %c0_i32, %c0_i32_0 : i32, i32
  }
  func.func @transform_3(%arg0: i32) -> (i32, i32) {
    %c0_i32 = arith.constant 0 : i32
    %c0_i32_0 = arith.constant 0 : i32
    %c0_i32_1 = arith.constant 0 : i32
    return %c0_i32, %c0_i32_0 : i32, i32
  }
}

</mosaic_0001>

<bundles_post_ra>
// kernel: tpu_custom_call.1
= control target key start
LH: loop header
LB: loop body
LE: loop exit
PB: predicated region body
PF: predicated region fallthrough
CT: control target
= control target key end

     0   :  { %s154_s0 = inlined_call_operand.vmem [shape: f32[8,64], index: 0, kind: input, shape index: {}]   ;;  %s155_s1 = inlined_call_operand.vmem [shape: f32[64,32], index: 1, kind: input, shape index: {}]   ;;  %s156_s2 = inlined_call_operand.vmem [shape: f32[1,32], index: 2, kind: input, shape index: {}]   ;;  %s157_s3 = inlined_call_operand.hbm [shape: f32[8,32], index: 3, kind: output, shape index: {}]  }
   0x1   :  { %v24_v0 = vld [vmem:[%s155_s1 + $0x38] sm:$0xff]  ;;  %v23_v1 = vld [vmem:[%s155_s1 + $0x30] sm:$0xff]  ;;  %v22_v2 = vld [vmem:[%s155_s1 + $0x28] sm:$0xff] }
   0x2   :  { %41 = vmatpush.msra.mxu0 %v24_v0  ;;  %v21_v3 = vld [vmem:[%s155_s1 + $0x20] sm:$0xff] }
   0x4   :  { %42 = vmatpush.msra.mxu0 %v23_v1 }
   0x5   :  { %8 = vsyncpa [#allocation3], 0  ;;  %v20_v4 = vld [vmem:[%s155_s1 + $0x18] sm:$0xff]  ;;  %v19_v5 = vld [vmem:[%s155_s1 + $0x10] sm:$0xff]  ;;  %vm29_vm0 = vcmask 523264   ;;  %s100_s5 = smov [#allocation2]  }
   0x6   :  { %43 = vmatpush.msra.mxu0 %v22_v2  ;;  %v15_v6 = vld [vmem:[%s154_s0] sm:$0xff]  ;;  %v18_v7 = vld [vmem:[%s155_s1 + $0x8] sm:$0xff]  ;;  %s60_s0 = sshll.u32 %s100_s5, 4  ;;  %s62_s8 = sshll.u32 %s157_s3, 4  ;;  %vm53_vm1 = vcmask 261120   ;;  %s61_s0 = int_to_ptr.vmem [resolvable:$true] %s60_s0  ;;  %s63_s8 = int_to_ptr.hbm [resolvable:$true] %s62_s8 }
   0x7   :  { %v17_v8 = vld [vmem:[%s155_s1] sm:$0xff]  ;;  %v16_v9 = vmax.f32 %v15_v6, 0.0 }
   0x8   :  { %44 = vmatpush.msra.mxu0 %v21_v3  ;;  %v73_v10 = vld [vmem:[%s156_s2] ss:$0 sm:$0xff] }
   0xa   :  { %45 = vmatpush.msra.mxu0 %v20_v4 }
   0xc   :  { %46 = vmatpush.msra.mxu0 %v19_v5 }
   0xe   :  { %47 = vmatpush.msra.mxu0 %v18_v7 }
  0x10   :  { %48 = vmatpush.msra.mxu0 %v17_v8 }
  0x11   :  { %71 = vmatmul.msk.f32.vlgmr.msra.gmra.mxu0 %vm29_vm0, %v16_v9 }
  0x8e   :  { %v50_v11 = vpop.f32.mrf.mxu0 }
  0x8f   :  { %v51_v12 = vadd.f32 %v73_v10, %v50_v11 }
  0x91   :  { %54 = vst.msk [vmem:[#allocation2] sm:$0xff] %vm53_vm1, %v51_v12 }
  0x92   :  { %65 = dma.vmem_to_hbm [thread:$0]  %s61_s0, 128, %s63_s8, [#allocation3]  }
  0x93   :  { %98 = dma.done.wait [#allocation3], 128  }
  0x94   :  { %99 = vsyncadd [#allocation3], 4294967168 }
  0x95   :  { %70 = vsyncpa [#allocation3], 1 }

</bundles_post_ra>
